<compile_context>
chip_gen: v6e
topology: v6e:2x2x1
jax: 0.10.0
libtpu: 0.0.40
codegen_flags: <defaults>
</compile_context>

<pallas_src>
import jax
import jax.numpy as jnp
from jax.experimental import pallas as pl
from jax.experimental.pallas import tpu as pltpu

VMEM_LIMIT = 32 * 1024 * 1024      # safe on v5e/v6e (128 MiB) and v7x (64 MiB)
BN_EPS = 1e-5


def _round_up(x, m):
    return (x + m - 1) // m * m


def _pick_tile(dim, align, target):
    """Return (padded_dim, tile): tile multiple of `align`, minimal padding."""
    d0 = _round_up(dim, align)
    if d0 <= target:
        return d0, d0
    best_pad, best_t = None, None
    t = target
    while t >= align:
        padded = _round_up(d0, t)
        if best_pad is None or padded < best_pad:
            best_pad, best_t = padded, t
        t -= align
    return best_pad, best_t


# --------------------------- tiled MXU matmul ---------------------------

def _make_mm_kernel(fuse_bn, has_bias):
    def kernel(*refs):
        i = 0
        a_ref = refs[i]; i += 1
        if fuse_bn:
            s_ref, t_ref = refs[i], refs[i + 1]; i += 2
        b_ref = refs[i]; i += 1
        if has_bias:
            bias_ref = refs[i]; i += 1
        o_ref, acc_ref = refs[i], refs[i + 1]

        k = pl.program_id(2)

        @pl.when(k == 0)
        def _():
            acc_ref[...] = jnp.zeros_like(acc_ref)

        a = a_ref[...]
        if fuse_bn:     # BN affine + ReLU prologue (free VPU work under MXU)
            a = jnp.maximum(a.astype(jnp.float32) * s_ref[...] + t_ref[...], 0.0)
            a = a.astype(jnp.bfloat16)
        acc_ref[...] += jnp.dot(a, b_ref[...], preferred_element_type=jnp.float32)

        @pl.when(k == pl.num_programs(2) - 1)
        def _():
            r = acc_ref[...]
            if has_bias:
                r = r + bias_ref[...]
            o_ref[...] = r.astype(o_ref.dtype)

    return kernel


def pallas_matmul(a, b, *, bias=None, scale=None, shift=None,
                  out_dtype=jnp.bfloat16):
    """[M,K]@[K,N] on the MXU (bf16 in, f32 acc).  Optional fused per-K-column
    BN affine + ReLU on `a` (scale/shift, length K) and fused bias (length N)."""
    M, K = a.shape
    Kb, N = b.shape
    assert K == Kb
    Mp, tm = _pick_tile(M, 8, 256)
    Np, tn = _pick_tile(N, 128, 256)
    Kp, tk = _pick_tile(K, 128, 512)

    fuse_bn = scale is not None
    has_bias = bias is not None

    a_p = jnp.pad(a.astype(jnp.bfloat16), ((0, Mp - M), (0, Kp - K)))
    b_p = jnp.pad(b.astype(jnp.bfloat16), ((0, Kp - K), (0, Np - N)))

    args = [a_p]
    in_specs = [pl.BlockSpec((tm, tk), lambda i, j, k: (i, k))]
    if fuse_bn:
        s_p = jnp.pad(scale.astype(jnp.float32).reshape(1, K),
                      ((0, 0), (0, Kp - K)))
        t_p = jnp.pad(shift.astype(jnp.float32).reshape(1, K),
                      ((0, 0), (0, Kp - K)))
        args += [s_p, t_p]
        in_specs += [pl.BlockSpec((1, tk), lambda i, j, k: (0, k)),
                     pl.BlockSpec((1, tk), lambda i, j, k: (0, k))]
    args.append(b_p)
    in_specs.append(pl.BlockSpec((tk, tn), lambda i, j, k: (k, j)))
    if has_bias:
        bias_p = jnp.pad(bias.astype(jnp.float32).reshape(1, N),
                         ((0, 0), (0, Np - N)))
        args.append(bias_p)
        in_specs.append(pl.BlockSpec((1, tn), lambda i, j, k: (0, j)))

    flops = 2 * Mp * Np * Kp
    bytes_accessed = (Mp * Kp + Kp * Np) * 2 + Mp * Np * jnp.dtype(out_dtype).itemsize

    out = pl.pallas_call(
        _make_mm_kernel(fuse_bn, has_bias),
        grid=(Mp // tm, Np // tn, Kp // tk),
        in_specs=in_specs,
        out_specs=pl.BlockSpec((tm, tn), lambda i, j, k: (i, j)),
        out_shape=jax.ShapeDtypeStruct((Mp, Np), out_dtype),
        scratch_shapes=[pltpu.VMEM((tm, tn), jnp.float32)],
        compiler_params=pltpu.CompilerParams(
            dimension_semantics=("parallel", "parallel", "arbitrary"),
            vmem_limit_bytes=VMEM_LIMIT),
        cost_estimate=pl.CostEstimate(flops=flops, transcendentals=0,
                                      bytes_accessed=bytes_accessed),
    )(*args)
    return out[:M, :N]


# ----------------------- BatchNorm (two-pass, tiled) -----------------------

def _bn_stats_kernel(x_ref, sum_ref, sq_ref):
    @pl.when(pl.program_id(0) == 0)
    def _():
        sum_ref[...] = jnp.zeros_like(sum_ref)
        sq_ref[...] = jnp.zeros_like(sq_ref)

    x = x_ref[...].astype(jnp.float32)
    sum_ref[...] += jnp.sum(x, axis=0, keepdims=True)
    sq_ref[...] += jnp.sum(x * x, axis=0, keepdims=True)


def bn_scale_shift(x2, gamma, beta, eps=BN_EPS):
    """Train-mode BN batch statistics over rows of x2 [M, C] -> per-channel
    affine (scale, shift) such that BN(x) = x*scale + shift."""
    M, C = x2.shape
    Cp = _round_up(C, 128)
    Mp, tm = _pick_tile(M, 8, 512)
    x_p = jnp.pad(x2, ((0, Mp - M), (0, Cp - C)))
    s, sq = pl.pallas_call(
        _bn_stats_kernel,
        grid=(Mp // tm,),
        in_specs=[pl.BlockSpec((tm, Cp), lambda i: (i, 0))],
        out_specs=[pl.BlockSpec((1, Cp), lambda i: (0, 0)),
                   pl.BlockSpec((1, Cp), lambda i: (0, 0))],
        out_shape=[jax.ShapeDtypeStruct((1, Cp), jnp.float32),
                   jax.ShapeDtypeStruct((1, Cp), jnp.float32)],
        compiler_params=pltpu.CompilerParams(
            dimension_semantics=("arbitrary",), vmem_limit_bytes=VMEM_LIMIT),
    )(x_p)
    s = s[0, :C]
    sq = sq[0, :C]
    mean = s / M
    var = jnp.maximum(sq / M - mean * mean, 0.0)   # biased var, clamp fp error
    inv = jax.lax.rsqrt(var + eps)
    scale = gamma * inv
    shift = beta - mean * scale
    return scale, shift


def _bn_apply_kernel(x_ref, s_ref, t_ref, o_ref):
    y = jnp.maximum(x_ref[...].astype(jnp.float32) * s_ref[...] + t_ref[...], 0.0)
    o_ref[...] = y.astype(o_ref.dtype)


def bn_relu_apply(x2, scale, shift):
    """Row-tiled BN affine + ReLU on x2 [M, C] -> bf16 [M, C]."""
    M, C = x2.shape
    Cp = _round_up(C, 128)
    Mp, tm = _pick_tile(M, 8, 512)
    x_p = jnp.pad(x2, ((0, Mp - M), (0, Cp - C)))
    s_p = jnp.pad(scale.reshape(1, C), ((0, 0), (0, Cp - C)))
    t_p = jnp.pad(shift.reshape(1, C), ((0, 0), (0, Cp - C)))
    y = pl.pallas_call(
        _bn_apply_kernel,
        grid=(Mp // tm,),
        in_specs=[pl.BlockSpec((tm, Cp), lambda i: (i, 0)),
                  pl.BlockSpec((1, Cp), lambda i: (0, 0)),
                  pl.BlockSpec((1, Cp), lambda i: (0, 0))],
        out_specs=pl.BlockSpec((tm, Cp), lambda i: (i, 0)),
        out_shape=jax.ShapeDtypeStruct((Mp, Cp), jnp.bfloat16),
        compiler_params=pltpu.CompilerParams(
            dimension_semantics=("parallel",), vmem_limit_bytes=VMEM_LIMIT),
    )(x_p, s_p, t_p)
    return y[:M, :C]


def _bn_gap_kernel(x_ref, s_ref, t_ref, o_ref):
    x = x_ref[0].astype(jnp.float32)                       # (HW, Cp)
    y = jnp.maximum(x * s_ref[...] + t_ref[...], 0.0)
    o_ref[0] = jnp.mean(y, axis=0, keepdims=True)


def bn_relu_gap(x, scale, shift):
    """Fused norm5 + ReLU + adaptive_avg_pool2d((1,1)) + flatten (NHWC->N,C)."""
    N, H, W, C = x.shape
    HW = H * W
    Cp = _round_up(C, 128)
    x3 = jnp.pad(x.reshape(N, HW, C), ((0, 0), (0, 0), (0, Cp - C)))
    s_p = jnp.pad(scale.reshape(1, C), ((0, 0), (0, Cp - C)))
    t_p = jnp.pad(shift.reshape(1, C), ((0, 0), (0, Cp - C)))
    out = pl.pallas_call(
        _bn_gap_kernel,
        grid=(N,),
        in_specs=[pl.BlockSpec((1, HW, Cp), lambda n: (n, 0, 0)),
                  pl.BlockSpec((1, Cp), lambda n: (0, 0)),
                  pl.BlockSpec((1, Cp), lambda n: (0, 0))],
        out_specs=pl.BlockSpec((1, 1, Cp), lambda n: (n, 0, 0)),
        out_shape=jax.ShapeDtypeStruct((N, 1, Cp), jnp.float32),
        compiler_params=pltpu.CompilerParams(
            dimension_semantics=("parallel",), vmem_limit_bytes=VMEM_LIMIT),
    )(x3, s_p, t_p)
    return out.reshape(N, Cp)[:, :C]


# --------------------------- conv / pooling glue ---------------------------

def conv2d_nhwc(x, wmat, kh, kw, stride, padding):
    """NHWC bias-free conv via im2col + Pallas matmul.  wmat: (kh*kw*Cin, Cout)."""
    N, H, W, C = x.shape
    Cout = wmat.shape[1]
    OH = (H + 2 * padding - kh) // stride + 1
    OW = (W + 2 * padding - kw) // stride + 1
    if kh == 1 and kw == 1 and stride == 1 and padding == 0:
        patches = x.reshape(N * H * W, C)
    else:
        xp = jnp.pad(x, ((0, 0), (padding, padding), (padding, padding), (0, 0)))
        # TODO(synk): form patches in-kernel (overlapping-tile DMA / halo) to
        # avoid materializing kh*kw shifted copies of the activation in HBM.
        cols = [xp[:, i:i + stride * OH:stride, j:j + stride * OW:stride, :]
                for i in range(kh) for j in range(kw)]
        patches = jnp.concatenate(cols, axis=-1).reshape(N * OH * OW, kh * kw * C)
    y = pallas_matmul(patches, wmat, out_dtype=jnp.bfloat16)
    return y.reshape(N, OH, OW, Cout)


def maxpool_3x3_s2_p1(x):
    N, H, W, C = x.shape
    OH = (H + 2 - 3) // 2 + 1
    OW = (W + 2 - 3) // 2 + 1
    xp = jnp.pad(x, ((0, 0), (1, 1), (1, 1), (0, 0)), constant_values=-jnp.inf)
    out = None
    for i in range(3):
        for j in range(3):
            s = xp[:, i:i + 2 * OH:2, j:j + 2 * OW:2, :]
            out = s if out is None else jnp.maximum(out, s)
    return out


def avgpool_2x2(x):
    N, H, W, C = x.shape
    x = x.reshape(N, H // 2, 2, W // 2, 2, C).astype(jnp.float32)
    return x.mean(axis=(2, 4)).astype(jnp.bfloat16)


# ------------------------------ parameters ------------------------------

def init_params(key, input_dim=3, output_dim=10, growth_rate=32,
                block_config=(6, 12, 24, 16), num_init_features=64, bn_size=4):
    keys = iter(jax.random.split(key, 4096))

    def conv_w(kh, kw, cin, cout):
        fan_in = cin * kh * kw
        w = jax.random.normal(next(keys), (kh, kw, cin, cout), jnp.float32)
        w = w * jnp.sqrt(2.0 / fan_in)
        # (kh, kw, cin, cout) -> (kh*kw*cin, cout): matches im2col column order.
        return w.reshape(kh * kw * cin, cout).astype(jnp.bfloat16)

    def bn_p(c):
        return {"gamma": jnp.ones((c,), jnp.float32),
                "beta": jnp.zeros((c,), jnp.float32)}

    params = {"conv0": conv_w(7, 7, input_dim, num_init_features),
              "norm0": bn_p(num_init_features)}
    nf = num_init_features
    blocks = []
    for bi, nl in enumerate(block_config):
        layers = []
        for li in range(nl):
            cin = nf + li * growth_rate
            layers.append({
                "norm1": bn_p(cin),
                "conv1": conv_w(1, 1, cin, bn_size * growth_rate),
                "norm2": bn_p(bn_size * growth_rate),
                "conv2": conv_w(3, 3, bn_size * growth_rate, growth_rate),
            })
        blocks.append(layers)
        nf += nl * growth_rate
        if bi != len(block_config) - 1:
            params["trans%d" % (bi + 1)] = {"norm": bn_p(nf),
                                            "conv": conv_w(1, 1, nf, nf // 2)}
            nf //= 2
    params["blocks"] = blocks
    params["norm5"] = bn_p(nf)
    bound = 1.0 / float(nf) ** 0.5
    params["cls_w"] = jax.random.uniform(next(keys), (nf, output_dim),
                                         jnp.float32, -bound, bound)
    params["cls_b"] = jax.random.uniform(next(keys), (output_dim,),
                                         jnp.float32, -bound, bound)
    params["num_features"] = nf
    return params


# ------------------------------ forward ------------------------------

def densenet_forward(params, x, embedding=False):
    """Returns (out, embd) exactly like DenseNetClassifier.forward.
    BN uses train-mode batch statistics (PyTorch module default)."""
    if embedding:
        embd = x
    else:
        # NCHW (PyTorch convention) -> NHWC once; backbone stays NHWC in bf16.
        h = jnp.transpose(x, (0, 2, 3, 1)).astype(jnp.bfloat16)
        h = conv2d_nhwc(h, params["conv0"], 7, 7, 2, 3)            # conv0
        N, H, W, C = h.shape
        sc, sh = bn_scale_shift(h.reshape(N * H * W, C), **params["norm0"])
        h = bn_relu_apply(h.reshape(N * H * W, C), sc, sh).reshape(N, H, W, C)
        h = maxpool_3x3_s2_p1(h)                                   # pool0

        for bi, layers in enumerate(params["blocks"]):
            for lp in layers:                                      # dense layer
                N, H, W, C = h.shape
                h2 = h.reshape(N * H * W, C)
                # norm1 + relu1 fused as prologue of the 1x1 conv matmul
                sc1, sh1 = bn_scale_shift(h2, **lp["norm1"])
                y = pallas_matmul(h2, lp["conv1"], scale=sc1, shift=sh1,
                                  out_dtype=jnp.bfloat16)
                Ci = y.shape[1]
                # norm2 + relu2 (separate: 3x3 conv zero-pads AFTER BN+ReLU)
                sc2, sh2 = bn_scale_shift(y, **lp["norm2"])
                y = bn_relu_apply(y, sc2, sh2).reshape(N, H, W, Ci)
                y = conv2d_nhwc(y, lp["conv2"], 3, 3, 1, 1)
                # TODO(synk): write conv2 output directly into a preallocated
                # wide feature buffer via out_specs channel offsets instead of
                # per-layer lane-axis concatenation.
                h = jnp.concatenate([h, y], axis=-1)
            if bi != len(params["blocks"]) - 1:                    # transition
                tp = params["trans%d" % (bi + 1)]
                N, H, W, C = h.shape
                h2 = h.reshape(N * H * W, C)
                sc, sh = bn_scale_shift(h2, **tp["norm"])
                h = pallas_matmul(h2, tp["conv"], scale=sc, shift=sh,
                                  out_dtype=jnp.bfloat16).reshape(N, H, W, -1)
                h = avgpool_2x2(h)

        # norm5 + F.relu + F.adaptive_avg_pool2d((1,1)) + flatten, fused
        N, H, W, C = h.shape
        sc, sh = bn_scale_shift(h.reshape(N * H * W, C), **params["norm5"])
        embd = bn_relu_gap(h, sc, sh)                              # (N, C) f32
        # emb_size=0 -> hidden_layers is None; dropout=0.0 -> no-op

    out = pallas_matmul(embd, params["cls_w"], bias=params["cls_b"],
                        out_dtype=jnp.float32)
    return out, embd


if __name__ == "__main__":
    key = jax.random.PRNGKey(0)
    xkey, pkey = jax.random.split(key)
    # 32x32 input keeps every DenseNet-121 stage at spatial size >= 1.
    x = jax.random.normal(xkey, (2, 3, 32, 32), jnp.float32)
    params = init_params(pkey, input_dim=3, output_dim=10)

    out, embd = densenet_forward(params, x)
    out = jax.block_until_ready(out)
    embd = jax.block_until_ready(embd)

    assert out.shape == (2, 10), out.shape
    assert embd.shape == (2, params["num_features"]), embd.shape
    assert bool(jnp.all(jnp.isfinite(out))) and bool(jnp.all(jnp.isfinite(embd)))

    # also exercise the embedding=True path (classifier on a given embedding)
    out2, embd2 = densenet_forward(params, embd, embedding=True)
    jax.block_until_ready(out2)
    assert out2.shape == (2, 10)

    print("KERNEL_OK")
</pallas_src>

<mosaic_0001>
module attributes {stable_mosaic.version = 11 : i64} {
  func.func @kernel(%arg0: i32, %arg1: i32, %arg2: i32, %arg3: memref<256x256xbf16, #tpu.memory_space<vmem>>, %arg4: memref<256x128xbf16, #tpu.memory_space<vmem>>, %arg5: memref<256x128xbf16, #tpu.memory_space<vmem>>, %arg6: memref<256x128xf32, #tpu.memory_space<vmem>>) attributes {dimension_semantics = [#tpu.dimension_semantics<parallel>, #tpu.dimension_semantics<parallel>, #tpu.dimension_semantics<arbitrary>], iteration_bounds = array<i64: 2, 1, 1>, scalar_prefetch = 0 : i64, scratch_operands = 1 : i64, tpu.core_type = #tpu.core_type<tc>, window_params = [{transform_indices = @transform_0, window_bounds = array<i64: 256, 256>}, {transform_indices = @transform_1, window_bounds = array<i64: 256, 128>}, {transform_indices = @transform_2, window_bounds = array<i64: 256, 128>}]} {
    %c0_i32 = arith.constant 0 : i32
    %0 = arith.cmpi eq, %arg2, %c0_i32 : i32
    %1 = arith.extui %0 : i1 to i32
    %c0_i32_0 = arith.constant 0 : i32
    %2 = arith.cmpi ne, %1, %c0_i32_0 : i32
    scf.if %2 {
      %cst_10 = arith.constant 0.000000e+00 : f32
      %12 = vector.broadcast %cst_10 : f32 to vector<256x128xf32>
      %c0_11 = arith.constant 0 : index
      %c0_12 = arith.constant 0 : index
      %13 = vector.load %arg6[%c0_11, %c0_12] : memref<256x128xf32, #tpu.memory_space<vmem>>, vector<256x128xf32>
      tpu.vector_store %arg6[%c0_11, %c0_12], %12 {strides = array<i32>} : memref<256x128xf32, #tpu.memory_space<vmem>>, vector<256x128xf32>,
    } else {
    }
    %c0 = arith.constant 0 : index
    %c0_1 = arith.constant 0 : index
    %3 = vector.load %arg3[%c0, %c0_1] : memref<256x256xbf16, #tpu.memory_space<vmem>>, vector<256x256xbf16>
    %c0_2 = arith.constant 0 : index
    %c0_3 = arith.constant 0 : index
    %4 = vector.load %arg6[%c0_2, %c0_3] : memref<256x128xf32, #tpu.memory_space<vmem>>, vector<256x128xf32>
    %c0_4 = arith.constant 0 : index
    %c0_5 = arith.constant 0 : index
    %5 = vector.load %arg4[%c0_4, %c0_5] : memref<256x128xbf16, #tpu.memory_space<vmem>>, vector<256x128xbf16>
    %cst = arith.constant dense<0.000000e+00> : vector<256x128xf32>
    %6 = tpu.matmul %3, %5, %cst {dimension_numbers = #tpu.dot_dimension_numbers<[1], [0], [0], [1], [0, 0, 1, 1], [], []>} : vector<256x256xbf16>, vector<256x128xbf16>, vector<256x128xf32> -> vector<256x128xf32>
    %7 = arith.addf %4, %6 : vector<256x128xf32>
    %c0_6 = arith.constant 0 : index
    %c0_7 = arith.constant 0 : index
    %8 = vector.load %arg6[%c0_6, %c0_7] : memref<256x128xf32, #tpu.memory_space<vmem>>, vector<256x128xf32>
    tpu.vector_store %arg6[%c0_6, %c0_7], %7 {strides = array<i32>} : memref<256x128xf32, #tpu.memory_space<vmem>>, vector<256x128xf32>,
    %c0_i32_8 = arith.constant 0 : i32
    %9 = arith.cmpi eq, %arg2, %c0_i32_8 : i32
    %10 = arith.extui %9 : i1 to i32
    %c0_i32_9 = arith.constant 0 : i32
    %11 = arith.cmpi ne, %10, %c0_i32_9 : i32
    scf.if %11 {
      %c0_10 = arith.constant 0 : index
      %c0_11 = arith.constant 0 : index
      %12 = vector.load %arg6[%c0_10, %c0_11] : memref<256x128xf32, #tpu.memory_space<vmem>>, vector<256x128xf32>
      %13 = arith.truncf %12 : vector<256x128xf32> to vector<256x128xbf16>
      %c0_12 = arith.constant 0 : index
      %c0_13 = arith.constant 0 : index
      %14 = vector.load %arg5[%c0_12, %c0_13] : memref<256x128xbf16, #tpu.memory_space<vmem>>, vector<256x128xbf16>
      tpu.vector_store %arg5[%c0_12, %c0_13], %13 {strides = array<i32>} : memref<256x128xbf16, #tpu.memory_space<vmem>>, vector<256x128xbf16>,
    } else {
    }
    return
  }
  func.func @transform_0(%arg0: i32, %arg1: i32, %arg2: i32) -> (i32, i32) {
    %c0_i32 = arith.constant 0 : i32
    return %arg0, %arg2 : i32, i32
  }
  func.func @transform_1(%arg0: i32, %arg1: i32, %arg2: i32) -> (i32, i32) {
    %c0_i32 = arith.constant 0 : i32
    return %arg2, %arg1 : i32, i32
  }
  func.func @transform_2(%arg0: i32, %arg1: i32, %arg2: i32) -> (i32, i32) {
    %c0_i32 = arith.constant 0 : i32
    return %arg0, %arg1 : i32, i32
  }
}

</mosaic_0001>

<bundles_post_ra>
// kernel: tpu_custom_call.1
= control target key start
LH: loop header
LB: loop body
LE: loop exit
PB: predicated region body
PF: predicated region fallthrough
CT: control target
= control target key end

     0   :  { %7 = vsyncpa [#allocation4], 0  ;;  %s2043_s0 = inlined_call_operand.hbm [shape: bf16[512,256], index: 0, kind: input, shape index: {}]   ;;  %s2044_s1 = inlined_call_operand.hbm [shape: bf16[256,128], index: 1, kind: input, shape index: {}]   ;;  %s2045_s2 = inlined_call_operand.hbm [shape: bf16[512,128], index: 2, kind: output, shape index: {}]  }
   0x1   :  { %9 = vsyncpa [#allocation4 + $0x1], 0 }
   0x2   :  { %10 = vsyncpa [#allocation7], 0 }
   0x3   :  { %11 = vsyncpa [#allocation5], 0 }
   0x4   :  { %13 = vsyncpa [#allocation5 + $0x1], 0  ;;  %s1808_s9 = smov 0   ;;  %s1810_s10 = smov 0  }
   0x5   :  { %s1812_s11 = smov 0   ;;  %s1814_s12 = smov 0  }
   0x6   :  { %s1816_s13 = smov 0   ;;  %s1818_s14 = smov 0  }
   0x7 LB: > { %s1145_s15 = sadd.s32 4294967295, %s1782_s14   ;;  %s1146_s16 = sadd.s32 4294967294, %s1782_s14   ;;  %s1782_s14 = sphi %s1818_s14, %s19_s14   ;;  %s1778_s13 = sphi %s1816_s13, %s2063_s13   ;;  %s1774_s12 = sphi %s1814_s12, %s2062_s12   ;;  %s1770_s11 = sphi %s1812_s11, %s2061_s11   ;;  %s1766_s10 = sphi %s1810_s10, %s2060_s10   ;;  %s1762_s9 = sphi %s1808_s9, %s2059_s9  }
   0x8   : > { %p60_p0 = scmp.ne.s32.totalorder %s1766_s10, %s1762_s9  ;;  %p1842_p1 = scmp.eq.s32.totalorder %s1145_s15, 0 }
   0x9   : > { %p1846_p2 = scmp.eq.s32.totalorder %s1145_s15, 1  ;;  %p120_p3 = scmp.eq.s32.totalorder %s1146_s16, 1 }
   0xa   : > { %p1852_p4 = por %p1842_p1, %p60_p0  ;;  %p1147_p5 = scmp.ge.s32.totalorder %s1782_s14, 1 }
   0xb   : > { %p1857_p6 = por %p120_p3, %p60_p0  ;;  %p127_p7 = scmp.lt.s32.totalorder %s1782_s14, 3 }
   0xc   : > { %s2049_s19 = scalar_select %p1852_p4, 1, 0 }
   0xd   : > { %s2050_s20 = scalar_select %p1857_p6, 1, 0 }
   0xe   : > { %p1862_p8 = pnand %p1147_p5, %p127_p7  ;;  %s1784_s22 = smov [#allocation6]  }
   0xf   : > { %s143_s23 = sshll.u32 %s1784_s22, 4  ;;  %s38_s25 = sadd.s32 1, %s1778_s13  ;;  %s144_s23 = int_to_ptr.vmem [resolvable:$true] %s143_s23 }
  0x10   : > { %p1509_p9 = pneg %p1862_p8  ;;  %s1655_s26 = scalar_lea.vmem %s144_s23, 2048 }
  0x11   : > { %p1656_p13 = scmp.ne.s32.totalorder %s144_s23, %s1655_s26  ;;  %p1663_p5 = scmp.lt.s32.totalorder %s144_s23, %s144_s23 }
  0x12   : > { %p1871_p11 = pnand %p1509_p9, %p1842_p1  ;;  %p1664_p7 = scmp.lt.s32.totalorder %s1655_s26, %s1655_s26 }
  0x14   : > { %p1646_p12 = pneg %p1871_p11  ;;  %p1665_p6 = por %p1664_p7, %p1663_p5 }
  0x16   : > { %p1658_p0 = pnand %p1656_p13, %p1646_p12 }
  0x18   : > { %p1659_p3 = pneg %p1658_p0 }
  0x1a   : > { %p1666_p4 = pnand %p1665_p6, %p1659_p3 }
  0x1c   : > { %1669 = shalt.err (!%p1666_p4)
}
  0x1d   : > { %s1785_s27 = smov 64   ;;  %s1786_s28 = smov 4  }
  0x1e   : > { %1512 = dma.hbm_to_vmem [thread:$0]  (!%p1871_p11), %s2044_s1, 2048, %s144_s23, [#allocation7], %s1785_s27, %s1785_s27, %s1786_s28  }
  0x1f   : > { %p40_p6 = scmp.ge.s32.totalorder %s38_s25, 2  ;;  %s47_s3 = sadd.s32 1, %s1770_s11 }
  0x20   : > { %p54_p4 = scmp.ne.s32.totalorder %s1770_s11, %s1766_s10  ;;  %p55_p9 = scmp.eq.s32.totalorder %s1782_s14, 0 }
  0x21   : > { %s2065_s25 = smov (%p40_p6, %s38_s25), 0  ;;  %p1522_p0 = scmp.lt.s32.totalorder %s1782_s14, 2 }
  0x22   : > { %p1889_p12 = por %p55_p9, %p54_p4  ;;  %p1895_p13 = por %p1846_p2, %p54_p4 }
  0x23   : > { %s42_s6 = ssub.s32 %s1778_s13, %s2065_s25  ;;  %s157_s7 = sand.u32 1, %s1770_s11  }
  0x24   : > { %p45_p11 = scmp.eq.s32.totalorder %s42_s6, 0  ;;  %s1150_s8 = sshll.u32 %s157_s7, 8 }
  0x25   : > { %s1244_s16 = sshll.u32 %s1778_s13, 12  ;;  %s161_s26 = scalar_lea.vmem [#allocation3], %s1150_s8 }
  0x26   : > { %s1904_s15 = scalar_select %p45_p11, %s1770_s11, %s47_s3  }
  0x27   : > { %s170_s24 = scalar_lea.hbm %s2043_s0, %s1244_s16  ;;  %s171_s27 = sshll.u32 %s161_s26, 4  ;;  %s172_s27 = int_to_ptr.vmem [resolvable:$true] %s171_s27 }
  0x28   : > { %p1912_p2 = pnand %p1522_p0, %p1889_p12  ;;  %s158_s28 = scalar_lea.sflag [#allocation4], %s157_s7 }
  0x29   : > { %s1683_s29 = scalar_lea.vmem %s172_s27, 4096  ;;  %s1787_s30 = smov [#allocation3]  }
  0x2a   : > { %p1672_p3 = pneg %p1912_p2  ;;  %p1684_p5 = scmp.ne.s32.totalorder %s172_s27, %s1683_s29 }
  0x2b   : > { %s1688_s3 = sshll.u32 %s1787_s30, 4  ;;  %s1689_s3 = int_to_ptr.vmem [resolvable:$false] %s1688_s3 }
  0x2c   : > { %p1686_p7 = pnand %p1684_p5, %p1672_p3  ;;  %s1690_s6 = scalar_lea.vmem %s1689_s3, 8192 }
  0x2d   : > { %p1691_p4 = scmp.lt.s32.totalorder %s172_s27, %s1689_s3  ;;  %p1692_p9 = scmp.lt.s32.totalorder %s1690_s6, %s1683_s29 }
  0x2e   : > { %p1687_p6 = pneg %p1686_p7 }
  0x2f   : > { %p1693_p11 = por %p1692_p9, %p1691_p4 }
  0x31   : > { %p1694_p10 = pnand %p1693_p11, %p1687_p6 }
  0x33   : > { %1697 = shalt.err (!%p1694_p10)
}
  0x34   : > { %s1788_s4 = smov 128   ;;  %s1789_s8 = smov 8  }
  0x35   : > { %1516 = dma.hbm_to_vmem [thread:$0]  (!%p1912_p2), %s170_s24, 4096, %s172_s27, %s158_s28, %s1788_s4, %s1788_s4, %s1789_s8  }
  0x36   : > { %183 = sbr.rel (%p1862_p8) target bundleno = 368 (0x170), region = 28  ;;  %s1923_s7 = sand.u32 (!%p1862_p8), 1, %s1766_s10  }
  0x37   : > { %s1155_s16 = sshll.u32 (!%p1862_p8), %s1923_s7, 8  ;;  %s186_s22 = scalar_lea.sflag (!%p1862_p8), [#allocation4], %s1923_s7 }
  0x38   : > { %s1927_s23 = scalar_lea.vmem (!%p1862_p8), [#allocation3], %s1155_s16  ;;  %p2056_p12 = scmp.ne.s32.totalorder (!%p1862_p8), %s2049_s19, 0 }
  0x3b   : > { %1749 = dma.done.wait (%p2056_p12), %s186_s22, 4096  }
  0x3c   : > { %1751 = vsyncadd (%p2056_p12), %s186_s22, 4294963200 }
  0x3d   : > { %1753 = dma.done.wait (%p1842_p1), [#allocation7], 2048  }
  0x3e   : > { %1755 = vsyncadd (%p1842_p1), [#allocation7], 4294965248  ;;  %v1580_v0 = vld [vmem:[#allocation6 + $0x78] sm:$0xff]   ;;  %v1582_v2 = vld [vmem:[#allocation6 + $0x70] sm:$0xff]   ;;  %s1157_s17 = sshll.u32 %s1923_s7, 7  ;;  %s1277_s21 = sshll.u32 %s1774_s12, 11 }
  0x3f   : > { %v1581_v1 = vld [vmem:[#allocation6 + $0x38] sm:$0xff]   ;;  %1373 = vmatprep.subr.bf16.mxu0 %v1580_v0  ;;  %1485 = vmatprep.subr.bf16.mxu1 %v1580_v0  ;;  %v1583_v3 = vld [vmem:[#allocation6 + $0x30] sm:$0xff]   ;;  %v1584_v4 = vld [vmem:[#allocation6 + $0x68] sm:$0xff]   ;;  %s1970_s19 = scalar_lea.vmem [#allocation8], %s1157_s17  ;;  %s1991_s18 = scalar_lea.hbm %s2045_s2, %s1277_s21 }
  0x40   : > { %1374 = vmatpush3.bf16.msra.mxu0 %v1581_v1  ;;  %1493 = vmatpush3.bf16.msra.mxu1 %v1581_v1  ;;  %v1585_v5 = vld [vmem:[#allocation6 + $0x28] sm:$0xff]   ;;  %v1586_v6 = vld [vmem:[#allocation6 + $0x60] sm:$0xff]   ;;  %v1588_v8 = vld [vmem:[#allocation6 + $0x58] sm:$0xff]   ;;  %s1042_s24 = sshll.u32 %s1970_s19, 4  ;;  %s1028_s12 = scalar_lea.sflag [#allocation5], %s1923_s7  ;;  %s1993_s24 = int_to_ptr.vmem [resolvable:$true] %s1042_s24 }
  0x41   : > { %1375 = vmatprep.subr.bf16.mxu0 %v1582_v2  ;;  %1486 = vmatprep.subr.bf16.mxu1 %v1582_v2  ;;  %v1587_v7 = vld [vmem:[#allocation6 + $0x20] sm:$0xff]   ;;  %v1589_v9 = vld [vmem:[#allocation6 + $0x18] sm:$0xff]   ;;  %v1590_v10 = vld [vmem:[#allocation6 + $0x50] sm:$0xff]   ;;  %s1698_s28 = scalar_lea.vmem %s1993_s24, 2048  ;;  %s1790_s29 = smov [#allocation8]  }
  0x42   : > { %v1598_v11 = vld [vmem:[%s1927_s23 + $0x4] ss:$8 sps:$4 sm:$0xff]   ;;  %v1591_v13 = vld [vmem:[#allocation6 + $0x10] sm:$0xff]   ;;  %v1596_v18 = vld [vmem:[%s1927_s23] ss:$8 sps:$4 sm:$0xff]   ;;  %p1699_p1 = scmp.ne.s32.totalorder %s1993_s24, %s1698_s28  ;;  %s1702_s30 = sshll.u32 %s1790_s29, 4  ;;  %s1703_s30 = int_to_ptr.vmem [resolvable:$false] %s1702_s30 }
  0x43   : > { %v1601_v12 = vld [vmem:[%s1927_s23 + $0x84] ss:$8 sps:$4 sm:$0xff]   ;;  %639 = vmatprep.mubr.bf16.mxu0 %v1598_v11  ;;  %v1599_v19 = vld [vmem:[%s1927_s23 + $0x80] ss:$8 sps:$4 sm:$0xff]   ;;  %v1602_v20 = vld [vmem:[%s1927_s23 + $0x14] ss:$8 sps:$4 sm:$0xff]   ;;  %p1705_p0 = scmp.lt.s32.totalorder %s1993_s24, %s1703_s30 }
  0x44   : > { %1376 = vmatpush3.bf16.msra.mxu0 %v1583_v3  ;;  %1494 = vmatpush3.bf16.msra.mxu1 %v1583_v3  ;;  %v1592_v14 = vld [vmem:[#allocation6 + $0x48] sm:$0xff]   ;;  %v1594_v16 = vld [vmem:[#allocation6 + $0x40] sm:$0xff]   ;;  %v1604_v21 = vld [vmem:[%s1927_s23 + $0x94] ss:$8 sps:$4 sm:$0xff]   ;;  %p1700_p8 = pnand %p1699_p1, %p1895_p13  ;;  %s1704_s3 = scalar_lea.vmem %s1703_s30, 4096 }
  0x45   : > { %1377 = vmatprep.subr.bf16.mxu0 %v1584_v4  ;;  %1487 = vmatprep.subr.bf16.mxu1 %v1584_v4  ;;  %v1593_v15 = vld [vmem:[#allocation6 + $0x8] sm:$0xff]   ;;  %v1595_v17 = vld [vmem:[#allocation6] sm:$0xff]   ;;  %v1606_v22 = vld [vmem:[%s1927_s23 + $0x10] ss:$8 sps:$4 sm:$0xff]   ;;  %p1706_p2 = scmp.lt.s32.totalorder %s1704_s3, %s1698_s28 }
  0x46   : > { %703 = vmatprep.mubr.bf16.mxu1 %v1601_v12  ;;  %v1607_v23 = vld [vmem:[%s1927_s23 + $0x90] ss:$8 sps:$4 sm:$0xff]   ;;  %v1608_v24 = vld [vmem:[%s1927_s23 + $0x24] ss:$8 sps:$4 sm:$0xff]   ;;  %v1612_v26 = vld [vmem:[%s1927_s23 + $0x20] ss:$8 sps:$4 sm:$0xff]   ;;  %p1701_p10 = pneg %p1700_p8 }
  0x47   : > { %v1610_v25 = vld [vmem:[%s1927_s23 + $0xa4] ss:$8 sps:$4 sm:$0xff]   ;;  %v1613_v27 = vld [vmem:[%s1927_s23 + $0xa0] ss:$8 sps:$4 sm:$0xff]   ;;  %v1614_v28 = vld [vmem:[%s1927_s23 + $0x34] ss:$8 sps:$4 sm:$0xff]   ;;  %p1707_p3 = por %p1706_p2, %p1705_p0 }
  0x48   : > { %1378 = vmatpush3.bf16.msra.mxu0 %v1585_v5  ;;  %1495 = vmatpush3.bf16.msra.mxu1 %v1585_v5  ;;  %v1616_v29 = vld [vmem:[%s1927_s23 + $0xb4] ss:$8 sps:$4 sm:$0xff]   ;;  %v1618_v30 = vld [vmem:[%s1927_s23 + $0x30] ss:$8 sps:$4 sm:$0xff]   ;;  %v1620_v32 = vld [vmem:[%s1927_s23 + $0x44] ss:$8 sps:$4 sm:$0xff]  }
  0x49   : > { %1379 = vmatprep.subr.bf16.mxu0 %v1586_v6  ;;  %1488 = vmatprep.subr.bf16.mxu1 %v1586_v6  ;;  %v1619_v31 = vld [vmem:[%s1927_s23 + $0xb0] ss:$8 sps:$4 sm:$0xff]   ;;  %v1622_v33 = vld [vmem:[%s1927_s23 + $0xc4] ss:$8 sps:$4 sm:$0xff]   ;;  %v1624_v34 = vld [vmem:[%s1927_s23 + $0x40] ss:$8 sps:$4 sm:$0xff]   ;;  %p1708_p5 = pnand %p1707_p3, %p1701_p10 }
  0x4a   : > { %v1625_v35 = vld [vmem:[%s1927_s23 + $0xc0] ss:$8 sps:$4 sm:$0xff]   ;;  %v1626_v36 = vld [vmem:[%s1927_s23 + $0x54] ss:$8 sps:$4 sm:$0xff]   ;;  %v1630_v38 = vld [vmem:[%s1927_s23 + $0x50] ss:$8 sps:$4 sm:$0xff]  }
  0x4b   : > { %v1628_v37 = vld [vmem:[%s1927_s23 + $0xd4] ss:$8 sps:$4 sm:$0xff]   ;;  %v1631_v39 = vld [vmem:[%s1927_s23 + $0xd0] ss:$8 sps:$4 sm:$0xff]   ;;  %v1632_v40 = vld [vmem:[%s1927_s23 + $0x64] ss:$8 sps:$4 sm:$0xff]  }
  0x4c   : > { %1380 = vmatpush3.bf16.msra.mxu0 %v1587_v7  ;;  %1496 = vmatpush3.bf16.msra.mxu1 %v1587_v7  ;;  %v1634_v41 = vld [vmem:[%s1927_s23 + $0xe4] ss:$8 sps:$4 sm:$0xff]   ;;  %v1636_v42 = vld [vmem:[%s1927_s23 + $0x60] ss:$8 sps:$4 sm:$0xff]   ;;  %v1638_v44 = vld [vmem:[%s1927_s23 + $0x74] ss:$8 sps:$4 sm:$0xff]  }
  0x4d   : > { %1381 = vmatprep.subr.bf16.mxu0 %v1588_v8  ;;  %1489 = vmatprep.subr.bf16.mxu1 %v1588_v8  ;;  %v1637_v43 = vld [vmem:[%s1927_s23 + $0xe0] ss:$8 sps:$4 sm:$0xff]   ;;  %v1640_v45 = vld [vmem:[%s1927_s23 + $0xf4] ss:$8 sps:$4 sm:$0xff]   ;;  %v1642_v46 = vld [vmem:[%s1927_s23 + $0x70] ss:$8 sps:$4 sm:$0xff]  }
  0x4e   : > { %v1643_v47 = vld [vmem:[%s1927_s23 + $0xf0] ss:$8 sps:$4 sm:$0xff]  }
  0x50   : > { %1382 = vmatpush3.bf16.msra.mxu0 %v1589_v9  ;;  %1497 = vmatpush3.bf16.msra.mxu1 %v1589_v9 }
  0x51   : > { %1383 = vmatprep.subr.bf16.mxu0 %v1590_v10  ;;  %1490 = vmatprep.subr.bf16.mxu1 %v1590_v10 }
  0x54   : > { %1384 = vmatpush3.bf16.msra.mxu0 %v1591_v13  ;;  %1498 = vmatpush3.bf16.msra.mxu1 %v1591_v13 }
  0x55   : > { %1385 = vmatprep.subr.bf16.mxu0 %v1592_v14  ;;  %1491 = vmatprep.subr.bf16.mxu1 %v1592_v14 }
  0x58   : > { %1386 = vmatpush3.bf16.msra.mxu0 %v1593_v15  ;;  %1499 = vmatpush3.bf16.msra.mxu1 %v1593_v15 }
  0x59   : > { %1387 = vmatprep.subr.bf16.mxu0 %v1594_v16  ;;  %1492 = vmatprep.subr.bf16.mxu1 %v1594_v16 }
  0x5c   : > { %1388 = vmatpush3.bf16.msra.mxu0 %v1595_v17  ;;  %1500 = vmatpush3.bf16.msra.mxu1 %v1595_v17 }
  0x5f   : > { %640 = vmatmul.mubr.bf16.vlgmr.msra.gmra.mxu0 %v1596_v18  ;;  %704 = vmatmul.mubr.bf16.vlgmr.msra.gmra.mxu1 %v1599_v19 }
  0x60   : > { %647 = vmatprep.mubr.bf16.mxu0 %v1602_v20  ;;  %711 = vmatprep.mubr.bf16.mxu1 %v1604_v21 }
  0x67   : > { %648 = vmatmul.mubr.bf16.gmra.mxu0 %v1606_v22  ;;  %712 = vmatmul.mubr.bf16.gmra.mxu1 %v1607_v23 }
  0x68   : > { %655 = vmatprep.mubr.bf16.mxu0 %v1608_v24  ;;  %719 = vmatprep.mubr.bf16.mxu1 %v1610_v25 }
  0x6f   : > { %656 = vmatmul.mubr.bf16.gmra.mxu0 %v1612_v26  ;;  %720 = vmatmul.mubr.bf16.gmra.mxu1 %v1613_v27 }
  0x70   : > { %663 = vmatprep.mubr.bf16.mxu0 %v1614_v28  ;;  %727 = vmatprep.mubr.bf16.mxu1 %v1616_v29 }
  0x77   : > { %664 = vmatmul.mubr.bf16.gmra.mxu0 %v1618_v30  ;;  %728 = vmatmul.mubr.bf16.gmra.mxu1 %v1619_v31 }
  0x78   : > { %671 = vmatprep.mubr.bf16.mxu0 %v1620_v32  ;;  %735 = vmatprep.mubr.bf16.mxu1 %v1622_v33 }
  0x7f   : > { %672 = vmatmul.mubr.bf16.gmra.mxu0 %v1624_v34  ;;  %736 = vmatmul.mubr.bf16.gmra.mxu1 %v1625_v35 }
  0x80   : > { %679 = vmatprep.mubr.bf16.mxu0 %v1626_v36  ;;  %743 = vmatprep.mubr.bf16.mxu1 %v1628_v37 }
  0x87   : > { %680 = vmatmul.mubr.bf16.gmra.mxu0 %v1630_v38  ;;  %744 = vmatmul.mubr.bf16.gmra.mxu1 %v1631_v39 }
  0x88   : > { %687 = vmatprep.mubr.bf16.mxu0 %v1632_v40  ;;  %751 = vmatprep.mubr.bf16.mxu1 %v1634_v41 }
  0x8f   : > { %688 = vmatmul.mubr.bf16.gmra.mxu0 %v1636_v42  ;;  %752 = vmatmul.mubr.bf16.gmra.mxu1 %v1637_v43 }
  0x90   : > { %695 = vmatprep.mubr.bf16.mxu0 %v1638_v44  ;;  %759 = vmatprep.mubr.bf16.mxu1 %v1640_v45 }
  0x97   : > { %696 = vmatmul.mubr.bf16.gmra.mxu0 %v1642_v46  ;;  %760 = vmatmul.mubr.bf16.gmra.mxu1 %v1643_v47 }
 0x11f   : > { %v1389_v48 = vpop.f32.mrf.mxu0  ;;  %v1437_v49 = vpop.f32.mrf.mxu1 }
 0x121   : > { %v1390_v50 = vpop.f32.mrf.mxu0  ;;  %v1438_v51 = vpop.f32.mrf.mxu1 }
 0x122   : > { %v1391_v56 = vadd.f32 %v1390_v50, %v1389_v48  ;;  %v1439_v57 = vadd.f32 %v1438_v51, %v1437_v49 }
 0x123   : > { %v1392_v52 = vpop.f32.mrf.mxu0  ;;  %v1440_v53 = vpop.f32.mrf.mxu1 }
 0x125   : > { %v1393_v54 = vpop.f32.mrf.mxu0  ;;  %v1441_v55 = vpop.f32.mrf.mxu1 }
 0x126   : > { %v1394_v58 = vadd.f32 %v1393_v54, %v1392_v52  ;;  %v1442_v59 = vadd.f32 %v1441_v55, %v1440_v53 }
 0x127   : > { %v1395_v60 = vpop.f32.mrf.mxu0  ;;  %v1443_v61 = vpop.f32.mrf.mxu1 }
 0x128   : > { %v1281_v62 = vpack.c.bf16 %v1394_v58, %v1391_v56  ;;  %v1321_v63 = vpack.c.bf16 %v1442_v59, %v1439_v57 }
 0x129   : > { %v1396_v0 = vpop.f32.mrf.mxu0  ;;  %v1444_v1 = vpop.f32.mrf.mxu1 }
 0x12a   : > { %1282 = vst [vmem:[%s1970_s19] sm:$0xff] %v1281_v62   ;;  %1365 = vst [vmem:[%s1970_s19 + $0x40] sm:$0xff] %v1321_v63   ;;  %v1397_v6 = vadd.f32 %v1396_v0, %v1395_v60  ;;  %v1445_v7 = vadd.f32 %v1444_v1, %v1443_v61 }
 0x12b   : > { %v1398_v2 = vpop.f32.mrf.mxu0  ;;  %v1446_v3 = vpop.f32.mrf.mxu1 }
 0x12d   : > { %v1399_v4 = vpop.f32.mrf.mxu0  ;;  %v1447_v5 = vpop.f32.mrf.mxu1 }
 0x12e   : > { %v1400_v8 = vadd.f32 %v1399_v4, %v1398_v2  ;;  %v1448_v9 = vadd.f32 %v1447_v5, %v1446_v3 }
 0x12f   : > { %v1401_v10 = vpop.f32.mrf.mxu0  ;;  %v1449_v11 = vpop.f32.mrf.mxu1 }
 0x130   : > { %v1286_v12 = vpack.c.bf16 %v1400_v8, %v1397_v6  ;;  %v1326_v13 = vpack.c.bf16 %v1448_v9, %v1445_v7 }
 0x131   : > { %v1402_v14 = vpop.f32.mrf.mxu0  ;;  %v1450_v15 = vpop.f32.mrf.mxu1 }
 0x132   : > { %1358 = vst [vmem:[%s1970_s19 + $0x8] sm:$0xff] %v1286_v12   ;;  %1366 = vst [vmem:[%s1970_s19 + $0x48] sm:$0xff] %v1326_v13   ;;  %v1403_v20 = vadd.f32 %v1402_v14, %v1401_v10  ;;  %v1451_v21 = vadd.f32 %v1450_v15, %v1449_v11 }
 0x133   : > { %v1404_v16 = vpop.f32.mrf.mxu0  ;;  %v1452_v17 = vpop.f32.mrf.mxu1 }
 0x135   : > { %v1405_v18 = vpop.f32.mrf.mxu0  ;;  %v1453_v19 = vpop.f32.mrf.mxu1 }
 0x136   : > { %v1406_v22 = vadd.f32 %v1405_v18, %v1404_v16  ;;  %v1454_v23 = vadd.f32 %v1453_v19, %v1452_v17 }
 0x137   : > { %v1407_v24 = vpop.f32.mrf.mxu0  ;;  %v1455_v25 = vpop.f32.mrf.mxu1 }
 0x138   : > { %v1291_v26 = vpack.c.bf16 %v1406_v22, %v1403_v20  ;;  %v1331_v27 = vpack.c.bf16 %v1454_v23, %v1451_v21 }
 0x139   : > { %v1408_v28 = vpop.f32.mrf.mxu0  ;;  %v1456_v29 = vpop.f32.mrf.mxu1 }
 0x13a   : > { %1359 = vst [vmem:[%s1970_s19 + $0x10] sm:$0xff] %v1291_v26   ;;  %1367 = vst [vmem:[%s1970_s19 + $0x50] sm:$0xff] %v1331_v27   ;;  %v1409_v34 = vadd.f32 %v1408_v28, %v1407_v24  ;;  %v1457_v35 = vadd.f32 %v1456_v29, %v1455_v25 }
 0x13b   : > { %v1410_v30 = vpop.f32.mrf.mxu0  ;;  %v1458_v31 = vpop.f32.mrf.mxu1 }
 0x13d   : > { %v1411_v32 = vpop.f32.mrf.mxu0  ;;  %v1459_v33 = vpop.f32.mrf.mxu1 }
 0x13e   : > { %v1412_v36 = vadd.f32 %v1411_v32, %v1410_v30  ;;  %v1460_v37 = vadd.f32 %v1459_v33, %v1458_v31 }
 0x13f   : > { %v1413_v38 = vpop.f32.mrf.mxu0  ;;  %v1461_v39 = vpop.f32.mrf.mxu1 }
 0x140   : > { %v1296_v40 = vpack.c.bf16 %v1412_v36, %v1409_v34  ;;  %v1336_v41 = vpack.c.bf16 %v1460_v37, %v1457_v35 }
 0x141   : > { %v1414_v42 = vpop.f32.mrf.mxu0  ;;  %v1462_v43 = vpop.f32.mrf.mxu1 }
 0x142   : > { %1360 = vst [vmem:[%s1970_s19 + $0x18] sm:$0xff] %v1296_v40   ;;  %1368 = vst [vmem:[%s1970_s19 + $0x58] sm:$0xff] %v1336_v41   ;;  %v1415_v48 = vadd.f32 %v1414_v42, %v1413_v38  ;;  %v1463_v49 = vadd.f32 %v1462_v43, %v1461_v39 }
 0x143   : > { %v1416_v44 = vpop.f32.mrf.mxu0  ;;  %v1464_v45 = vpop.f32.mrf.mxu1 }
 0x145   : > { %v1417_v46 = vpop.f32.mrf.mxu0  ;;  %v1465_v47 = vpop.f32.mrf.mxu1 }
 0x146   : > { %v1418_v50 = vadd.f32 %v1417_v46, %v1416_v44  ;;  %v1466_v51 = vadd.f32 %v1465_v47, %v1464_v45 }
 0x147   : > { %v1419_v52 = vpop.f32.mrf.mxu0  ;;  %v1467_v53 = vpop.f32.mrf.mxu1 }
 0x148   : > { %v1301_v54 = vpack.c.bf16 %v1418_v50, %v1415_v48  ;;  %v1341_v55 = vpack.c.bf16 %v1466_v51, %v1463_v49 }
 0x149   : > { %v1420_v56 = vpop.f32.mrf.mxu0  ;;  %v1468_v57 = vpop.f32.mrf.mxu1 }
 0x14a   : > { %1361 = vst [vmem:[%s1970_s19 + $0x20] sm:$0xff] %v1301_v54   ;;  %1369 = vst [vmem:[%s1970_s19 + $0x60] sm:$0xff] %v1341_v55   ;;  %v1421_v62 = vadd.f32 %v1420_v56, %v1419_v52  ;;  %v1469_v63 = vadd.f32 %v1468_v57, %v1467_v53 }
 0x14b   : > { %v1422_v58 = vpop.f32.mrf.mxu0  ;;  %v1470_v59 = vpop.f32.mrf.mxu1 }
 0x14d   : > { %v1423_v60 = vpop.f32.mrf.mxu0  ;;  %v1471_v61 = vpop.f32.mrf.mxu1 }
 0x14e   : > { %v1424_v0 = vadd.f32 %v1423_v60, %v1422_v58  ;;  %v1472_v1 = vadd.f32 %v1471_v61, %v1470_v59 }
 0x14f   : > { %v1425_v2 = vpop.f32.mrf.mxu0  ;;  %v1473_v3 = vpop.f32.mrf.mxu1 }
 0x150   : > { %v1306_v4 = vpack.c.bf16 %v1424_v0, %v1421_v62  ;;  %v1346_v5 = vpack.c.bf16 %v1472_v1, %v1469_v63 }
 0x151   : > { %v1426_v6 = vpop.f32.mrf.mxu0  ;;  %v1474_v7 = vpop.f32.mrf.mxu1 }
 0x152   : > { %1362 = vst [vmem:[%s1970_s19 + $0x28] sm:$0xff] %v1306_v4   ;;  %1370 = vst [vmem:[%s1970_s19 + $0x68] sm:$0xff] %v1346_v5   ;;  %v1427_v12 = vadd.f32 %v1426_v6, %v1425_v2  ;;  %v1475_v13 = vadd.f32 %v1474_v7, %v1473_v3 }
 0x153   : > { %v1428_v8 = vpop.f32.mrf.mxu0  ;;  %v1476_v9 = vpop.f32.mrf.mxu1 }
 0x155   : > { %v1429_v10 = vpop.f32.mrf.mxu0  ;;  %v1477_v11 = vpop.f32.mrf.mxu1 }
 0x156   : > { %v1430_v14 = vadd.f32 %v1429_v10, %v1428_v8  ;;  %v1478_v15 = vadd.f32 %v1477_v11, %v1476_v9 }
 0x157   : > { %v1431_v16 = vpop.f32.mrf.mxu0  ;;  %v1479_v17 = vpop.f32.mrf.mxu1 }
 0x158   : > { %v1311_v18 = vpack.c.bf16 %v1430_v14, %v1427_v12  ;;  %v1351_v19 = vpack.c.bf16 %v1478_v15, %v1475_v13 }
 0x159   : > { %v1432_v20 = vpop.f32.mrf.mxu0  ;;  %v1480_v21 = vpop.f32.mrf.mxu1 }
 0x15a   : > { %1363 = vst [vmem:[%s1970_s19 + $0x30] sm:$0xff] %v1311_v18   ;;  %1371 = vst [vmem:[%s1970_s19 + $0x70] sm:$0xff] %v1351_v19   ;;  %v1433_v26 = vadd.f32 %v1432_v20, %v1431_v16  ;;  %v1481_v27 = vadd.f32 %v1480_v21, %v1479_v17 }
 0x15b   : > { %v1434_v22 = vpop.f32.mrf.mxu0  ;;  %v1482_v23 = vpop.f32.mrf.mxu1 }
 0x15d   : > { %v1435_v24 = vpop.f32.mrf.mxu0  ;;  %v1483_v25 = vpop.f32.mrf.mxu1 }
 0x15e   : > { %v1436_v28 = vadd.f32 %v1435_v24, %v1434_v22  ;;  %v1484_v29 = vadd.f32 %v1483_v25, %v1482_v23 }
 0x160   : > { %v1316_v30 = vpack.c.bf16 %v1436_v28, %v1433_v26  ;;  %v1356_v31 = vpack.c.bf16 %v1484_v29, %v1481_v27 }
 0x162   : > { %1364 = vst [vmem:[%s1970_s19 + $0x38] sm:$0xff] %v1316_v30   ;;  %1372 = vst [vmem:[%s1970_s19 + $0x78] sm:$0xff] %v1356_v31  }
 0x163   : > { %1711 = shalt.err (!%p1708_p5)
}
 0x164   : > { %s1712_s6 = scalar_lea.hbm %s1991_s18, 2048  ;;  %s1716_s16 = scalar_lea.hbm %s2045_s2, 4096 }
 0x165   : > { %p1713_p7 = scmp.ne.s32.totalorder %s1991_s18, %s1712_s6  ;;  %p1717_p9 = scmp.lt.s32.totalorder %s1991_s18, %s2045_s2 }
 0x166   : > { %p1718_p11 = scmp.lt.s32.totalorder %s1716_s16, %s1712_s6 }
 0x167   : > { %p1714_p6 = pnand %p1713_p7, %p1895_p13 }
 0x168   : > { %p1719_p12 = por %p1718_p11, %p1717_p9 }
 0x169   : > { %p1715_p4 = pneg %p1714_p6 }
 0x16b   : > { %p1720_p1 = pnand %p1719_p12, %p1715_p4 }
 0x16d   : > { %1723 = shalt.err (!%p1720_p1)
}
 0x16e   : > { %s1791_s17 = smov 64   ;;  %s1792_s19 = smov 4  }
 0x16f   : > { %1507 = dma.vmem_to_hbm [thread:$0]  (%p1895_p13), %s1993_s24, 2048, %s1991_s18, %s1028_s12, %s1791_s17, %s1791_s17, %s1792_s19  }
 0x170 PF: > { %s1057_s21 = sand.u32 1, %s1762_s9   ;;  %p2057_p8 = scmp.ne.s32.totalorder %s2050_s20, 0 }
 0x171   : > { %p2058_p10 = scmp.ge.s32.totalorder %s1782_s14, 2  ;;  %s1058_s26 = scalar_lea.sflag [#allocation5], %s1057_s21 }
 0x173   : > { %p1518_p0 = pnand %p2058_p10, %p2057_p8 }
 0x175   : > { %p1519_p2 = pneg %p1518_p0 }
 0x177   : > { %1757 = dma.done.wait (%p1519_p2), %s1058_s26, 2048  }
 0x178   : > { %1759 = vsyncadd (%p1519_p2), %s1058_s26, 4294965248  ;;  %s19_s14 = sadd.s32 1, %s1782_s14   ;;  %s2059_s9 = smov %s1766_s10 }
 0x179   : > { %p16_p3 = scmp.ge.s32.totalorder %s19_s14, 4   ;;  %s2060_s10 = smov %s1770_s11 }
 0x17a   : > { %s2061_s11 = smov %s1904_s15  ;;  %s2062_s12 = smov %s1778_s13 }
 0x17b   : > { %s2063_s13 = smov %s2065_s25  ;;  %18 = sbr.rel (!%p16_p3) target bundleno = 7 (0x7), region = 86 }
 0x180   :  { %1063 = vsyncpa [#allocation4], 1 }
 0x181   :  { %1065 = vsyncpa [#allocation4 + $0x1], 1 }
 0x182   :  { %1066 = vsyncpa [#allocation7], 1 }
 0x183   :  { %1067 = vsyncpa [#allocation5], 1 }
 0x184   :  { %1069 = vsyncpa [#allocation5 + $0x1], 1 }

</bundles_post_ra>
